<compile_context>
chip_gen: v6e
topology: v6e:2x2x1
jax: 0.10.0
libtpu: 0.0.40
codegen_flags: <defaults>
</compile_context>

<pallas_src>
import functools

import jax
import jax.numpy as jnp
from jax.experimental import pallas as pl
from jax.experimental.pallas import tpu as pltpu

PACK = 8  # batch rows folded into the lane dimension


def _dense_mlp_kernel(x_ref, w1_ref, b1_ref, w2_ref, b2_ref, w3_ref, b3_ref,
                      o_ref):
    # Layer 1: Linear (no preceding activation, matching the PyTorch module).
    # bf16 operands, f32 accumulation on the MXU.
    x_bf = x_ref[...].astype(jnp.bfloat16)
    h = jnp.dot(x_bf, w1_ref[...], preferred_element_type=jnp.float32)
    h = h + b1_ref[...]
    h = jnp.maximum(h, 0.0)                      # ReLU (VPU, f32)

    # Layer 2: Linear + ReLU
    h = jnp.dot(h.astype(jnp.bfloat16), w2_ref[...],
                preferred_element_type=jnp.float32)
    h = h + b2_ref[...]
    h = jnp.maximum(h, 0.0)

    # Layer 3: Linear + Tanh output activation (EUP).
    h = jnp.dot(h.astype(jnp.bfloat16), w3_ref[...],
                preferred_element_type=jnp.float32)
    h = h + b3_ref[...]
    o_ref[...] = jnp.tanh(h).astype(o_ref.dtype)


def dense_reference(x, params):
    """Pure-JAX (f32) reference of the same forward."""
    h = x @ params["w1"] + params["b1"]
    h = jnp.maximum(h, 0.0)
    h = h @ params["w2"] + params["b2"]
    h = jnp.maximum(h, 0.0)
    h = h @ params["w3"] + params["b3"]
    return jnp.tanh(h)


def _round_up(n, m):
    return ((n + m - 1) // m) * m


def _choose_block_b(batch):
    # Cap the batch tile at 4096 rows (= 512 packed rows).  Per-step VMEM is
    # ~(x 0.5 MiB + out 0.25 MiB) double-buffered + ~1 MiB bf16 block-diag
    # weights + a few MiB of f32 intermediates -- comfortably under the
    # scoped-VMEM default on v5e/v6e (16/32 MiB of 128 MiB) and v7x
    # (32 MiB of 64 MiB), so no vmem_limit override is needed.
    bb = min(batch, 4096)
    # Guarantee >= 4 grid steps when the batch is large enough: 2 "parallel"
    # steps per v7x TensorCore keeps each core's input/output double-buffered.
    # Harmless on single-TC v5e/v6e.
    if batch >= 4 * 64:
        bb = min(bb, pl.cdiv(batch, 4))
    bb = max(64, (bb // 64) * 64)   # multiple of 64 -> packed rows multiple of 8
    return bb


def _block_diag(w, pack):
    """kron(I_pack, w): (in, out) -> (pack*in, pack*out), cast to bf16."""
    return jnp.kron(jnp.eye(pack, dtype=w.dtype), w).astype(jnp.bfloat16)


@functools.partial(jax.jit, static_argnames=("block_b",))
def dense_forward(x, params, *, block_b=None):
    """Fused 3-layer MLP forward.

    x:       (B, d0) float32
    params:  dict with w1 (d0,d1), b1 (1,d1), w2 (d1,d2), b2 (1,d2),
             w3 (d2,d3), b3 (1,d3)  -- weights (in, out), f32.
    """
    w1, b1 = params["w1"], params["b1"]
    w2, b2 = params["w2"], params["b2"]
    w3, b3 = params["w3"], params["b3"]

    B, d0 = x.shape
    d1, d2, d3 = w1.shape[1], w2.shape[1], w3.shape[1]

    # Tiny/medium batches: launch + per-step overhead dominates and XLA
    # fusion of three small GEMMs wins.  Use pure JAX.
    if block_b is None and B < 2048:
        return dense_reference(x, params)

    if block_b is None:
        block_b = _choose_block_b(B)
    # Clamp to a multiple of 64 rows so packed tiles are multiples of 8.
    block_b = max(64, (min(block_b, max(B, 64)) // 64) * 64)

    # Pad the batch so it divides evenly into block_b-row tiles.
    Bp = _round_up(B, block_b)
    if Bp != B:
        x = jnp.pad(x, ((0, Bp - B), (0, 0)))

    # ---- Lane packing: fold 8 batch rows into the lane dimension. ---------
    # Free row-major views in HBM; the math is identical because the weights
    # become block-diagonal (off-diagonal blocks are exact zeros).
    kp = PACK
    x_p = x.reshape(Bp // kp, kp * d0)                     # (Bp/8, 256)
    w1b = _block_diag(w1, kp)                              # (256, 512) bf16
    w2b = _block_diag(w2, kp)                              # (512, 512) bf16
    w3b = _block_diag(w3, kp)                              # (512, 128) bf16
    b1p = jnp.tile(b1, (1, kp))                            # (1, 512) f32
    b2p = jnp.tile(b2, (1, kp))                            # (1, 512) f32
    b3p = jnp.tile(b3, (1, kp))                            # (1, 128) f32

    block_rows = block_b // kp                             # packed rows / step
    grid = (Bp // block_b,)

    # Full-tensor blocks for the (small) weights/biases: same block index
    # every step, so they stay resident in VMEM across the grid.
    full = lambda shape: pl.BlockSpec(shape, lambda i: (0, 0))

    bytes_accessed = (
        Bp * d0 * 4 + Bp * d3 * 4                              # x in, out (f32)
        + 2 * (w1b.size + w2b.size + w3b.size)                 # bf16 weights
        + 4 * (b1p.size + b2p.size + b3p.size))                # f32 biases
    cost = pl.CostEstimate(
        flops=2 * Bp * (d0 * d1 + d1 * d2 + d2 * d3),
        transcendentals=Bp * d3,
        bytes_accessed=bytes_accessed)

    out_p = pl.pallas_call(
        _dense_mlp_kernel,
        out_shape=jax.ShapeDtypeStruct((Bp // kp, kp * d3), x.dtype),
        grid_spec=pl.GridSpec(
            grid=grid,
            in_specs=[
                # Streamed, lane-dense x tile (double buffered by the pipeline).
                pl.BlockSpec((block_rows, kp * d0), lambda i: (i, 0)),
                full((kp * d0, kp * d1)), full((1, kp * d1)),   # layer 1
                full((kp * d1, kp * d2)), full((1, kp * d2)),   # layer 2
                full((kp * d2, kp * d3)), full((1, kp * d3)),   # layer 3
            ],
            # Lane-dense output (128 lanes): unmasked vst writeback.
            out_specs=pl.BlockSpec((block_rows, kp * d3), lambda i: (i, 0)),
        ),
        compiler_params=pltpu.CompilerParams(
            dimension_semantics=("parallel",)),
        cost_estimate=cost,
    )(x_p, w1b, b1p, w2b, b2p, w3b, b3p)

    out = out_p.reshape(Bp, d3)
    if Bp != B:
        out = out[:B]   # padded rows (tanh of bias path) are discarded here
    return out


def init_dense_params(key, layers_dims):
    """Deterministic PyTorch-Linear-style init (uniform(-1/sqrt(fan_in), ...)).

    Returns weights already transposed to (in_features, out_features), f32.
    """
    assert len(layers_dims) == 4, "this script instantiates exactly 3 Linear layers"
    params = {}
    for li, (fan_in, fan_out) in enumerate(
            zip(layers_dims[:-1], layers_dims[1:]), start=1):
        key, kw, kb = jax.random.split(key, 3)
        bound = 1.0 / jnp.sqrt(jnp.float32(fan_in))
        params[f"w{li}"] = jax.random.uniform(
            kw, (fan_in, fan_out), jnp.float32, -bound, bound)
        params[f"b{li}"] = jax.random.uniform(
            kb, (1, fan_out), jnp.float32, -bound, bound)
    return params


if __name__ == "__main__":
    layers_dims = [32, 64, 64, 16]   # d0 -> d1 -> d2 -> d3
    batch = 512                      # small example batch

    key = jax.random.PRNGKey(0)
    key, kx = jax.random.split(key)
    x = jax.random.normal(kx, (batch, layers_dims[0]), jnp.float32)
    params = init_dense_params(key, layers_dims)
    ref = dense_reference(x, params)

    # Force the Pallas path (explicit block_b bypasses the small-batch
    # pure-JAX shortcut): block_b=128 -> 4 grid steps of 16 packed rows.
    out = jax.block_until_ready(dense_forward(x, params, block_b=128))
    assert out.shape == (batch, layers_dims[-1])
    # bf16 matmul operands with f32 accumulation: slightly loosened tolerance.
    assert jnp.allclose(out, ref, atol=3e-2, rtol=3e-2), "mismatch vs reference"

    # Exercise the padded (non-divisible) batch path through Pallas.
    x_odd = x[:300]
    out_odd = jax.block_until_ready(dense_forward(x_odd, params, block_b=128))
    assert out_odd.shape == (300, layers_dims[-1])
    assert jnp.allclose(out_odd, ref[:300], atol=3e-2, rtol=3e-2), "mismatch (padded path)"

    # Default path at this batch size is the pure-JAX bypass (B < 2048).
    out_bypass = jax.block_until_ready(dense_forward(x, params))
    assert jnp.allclose(out_bypass, ref, atol=1e-5, rtol=1e-5), "mismatch (bypass path)"

    print("KERNEL_OK")
</pallas_src>

<mosaic_0001>
module attributes {stable_mosaic.version = 11 : i64} {
  func.func @_dense_mlp_kernel(%arg0: i32, %arg1: memref<16x256xf32, #tpu.memory_space<vmem>>, %arg2: memref<256x512xbf16, #tpu.memory_space<vmem>>, %arg3: memref<1x512xf32, #tpu.memory_space<vmem>>, %arg4: memref<512x512xbf16, #tpu.memory_space<vmem>>, %arg5: memref<1x512xf32, #tpu.memory_space<vmem>>, %arg6: memref<512x128xbf16, #tpu.memory_space<vmem>>, %arg7: memref<1x128xf32, #tpu.memory_space<vmem>>, %arg8: memref<16x128xf32, #tpu.memory_space<vmem>>) attributes {dimension_semantics = [#tpu.dimension_semantics<parallel>], iteration_bounds = array<i64: 4>, scalar_prefetch = 0 : i64, scratch_operands = 0 : i64, tpu.core_type = #tpu.core_type<tc>, window_params = [{transform_indices = @transform_0, window_bounds = array<i64: 16, 256>}, {pipeline_mode = #tpu.pipeline_mode<synchronous>, transform_indices = @transform_1, window_bounds = array<i64: 256, 512>}, {pipeline_mode = #tpu.pipeline_mode<synchronous>, transform_indices = @transform_2, window_bounds = array<i64: 1, 512>}, {pipeline_mode = #tpu.pipeline_mode<synchronous>, transform_indices = @transform_3, window_bounds = array<i64: 512, 512>}, {pipeline_mode = #tpu.pipeline_mode<synchronous>, transform_indices = @transform_4, window_bounds = array<i64: 1, 512>}, {pipeline_mode = #tpu.pipeline_mode<synchronous>, transform_indices = @transform_5, window_bounds = array<i64: 512, 128>}, {pipeline_mode = #tpu.pipeline_mode<synchronous>, transform_indices = @transform_6, window_bounds = array<i64: 1, 128>}, {transform_indices = @transform_7, window_bounds = array<i64: 16, 128>}]} {
    %c0 = arith.constant 0 : index
    %c0_0 = arith.constant 0 : index
    %0 = vector.load %arg1[%c0, %c0_0] : memref<16x256xf32, #tpu.memory_space<vmem>>, vector<16x256xf32>
    %1 = arith.truncf %0 : vector<16x256xf32> to vector<16x256xbf16>
    %c0_1 = arith.constant 0 : index
    %c0_2 = arith.constant 0 : index
    %2 = vector.load %arg2[%c0_1, %c0_2] : memref<256x512xbf16, #tpu.memory_space<vmem>>, vector<256x512xbf16>
    %cst = arith.constant dense<0.000000e+00> : vector<16x512xf32>
    %3 = tpu.matmul %1, %2, %cst {dimension_numbers = #tpu.dot_dimension_numbers<[1], [0], [0], [1], [0, 0, 1, 1], [], []>} : vector<16x256xbf16>, vector<256x512xbf16>, vector<16x512xf32> -> vector<16x512xf32>
    %c0_3 = arith.constant 0 : index
    %c0_4 = arith.constant 0 : index
    %4 = vector.load %arg3[%c0_3, %c0_4] : memref<1x512xf32, #tpu.memory_space<vmem>>, vector<1x512xf32>
    %5 = vector.broadcast %4 : vector<1x512xf32> to vector<16x512xf32>
    %6 = arith.addf %3, %5 : vector<16x512xf32>
    %cst_5 = arith.constant 0.000000e+00 : f32
    %7 = vector.broadcast %cst_5 : f32 to vector<16x512xf32>
    %8 = arith.maximumf %6, %7 : vector<16x512xf32>
    %9 = arith.truncf %8 : vector<16x512xf32> to vector<16x512xbf16>
    %c0_6 = arith.constant 0 : index
    %c0_7 = arith.constant 0 : index
    %10 = vector.load %arg4[%c0_6, %c0_7] : memref<512x512xbf16, #tpu.memory_space<vmem>>, vector<512x512xbf16>
    %cst_8 = arith.constant dense<0.000000e+00> : vector<16x512xf32>
    %11 = tpu.matmul %9, %10, %cst_8 {dimension_numbers = #tpu.dot_dimension_numbers<[1], [0], [0], [1], [0, 0, 1, 1], [], []>} : vector<16x512xbf16>, vector<512x512xbf16>, vector<16x512xf32> -> vector<16x512xf32>
    %c0_9 = arith.constant 0 : index
    %c0_10 = arith.constant 0 : index
    %12 = vector.load %arg5[%c0_9, %c0_10] : memref<1x512xf32, #tpu.memory_space<vmem>>, vector<1x512xf32>
    %13 = vector.broadcast %12 : vector<1x512xf32> to vector<16x512xf32>
    %14 = arith.addf %11, %13 : vector<16x512xf32>
    %cst_11 = arith.constant 0.000000e+00 : f32
    %15 = vector.broadcast %cst_11 : f32 to vector<16x512xf32>
    %16 = arith.maximumf %14, %15 : vector<16x512xf32>
    %17 = arith.truncf %16 : vector<16x512xf32> to vector<16x512xbf16>
    %c0_12 = arith.constant 0 : index
    %c0_13 = arith.constant 0 : index
    %18 = vector.load %arg6[%c0_12, %c0_13] : memref<512x128xbf16, #tpu.memory_space<vmem>>, vector<512x128xbf16>
    %cst_14 = arith.constant dense<0.000000e+00> : vector<16x128xf32>
    %19 = tpu.matmul %17, %18, %cst_14 {dimension_numbers = #tpu.dot_dimension_numbers<[1], [0], [0], [1], [0, 0, 1, 1], [], []>} : vector<16x512xbf16>, vector<512x128xbf16>, vector<16x128xf32> -> vector<16x128xf32>
    %c0_15 = arith.constant 0 : index
    %c0_16 = arith.constant 0 : index
    %20 = vector.load %arg7[%c0_15, %c0_16] : memref<1x128xf32, #tpu.memory_space<vmem>>, vector<1x128xf32>
    %21 = vector.broadcast %20 : vector<1x128xf32> to vector<16x128xf32>
    %22 = arith.addf %19, %21 : vector<16x128xf32>
    %23 = math.tanh %22 : vector<16x128xf32>
    %c0_17 = arith.constant 0 : index
    %c0_18 = arith.constant 0 : index
    %24 = vector.load %arg8[%c0_17, %c0_18] : memref<16x128xf32, #tpu.memory_space<vmem>>, vector<16x128xf32>
    tpu.vector_store %arg8[%c0_17, %c0_18], %23 {strides = array<i32>} : memref<16x128xf32, #tpu.memory_space<vmem>>, vector<16x128xf32>,
    return
  }
  func.func @transform_0(%arg0: i32) -> (i32, i32) {
    %c0_i32 = arith.constant 0 : i32
    %c0_i32_0 = arith.constant 0 : i32
    return %arg0, %c0_i32 : i32, i32
  }
  func.func @transform_1(%arg0: i32) -> (i32, i32) {
    %c0_i32 = arith.constant 0 : i32
    %c0_i32_0 = arith.constant 0 : i32
    %c0_i32_1 = arith.constant 0 : i32
    return %c0_i32, %c0_i32_0 : i32, i32
  }
  func.func @transform_2(%arg0: i32) -> (i32, i32) {
    %c0_i32 = arith.constant 0 : i32
    %c0_i32_0 = arith.constant 0 : i32
    %c0_i32_1 = arith.constant 0 : i32
    return %c0_i32, %c0_i32_0 : i32, i32
  }
  func.func @transform_3(%arg0: i32) -> (i32, i32) {
    %c0_i32 = arith.constant 0 : i32
    %c0_i32_0 = arith.constant 0 : i32
    %c0_i32_1 = arith.constant 0 : i32
    return %c0_i32, %c0_i32_0 : i32, i32
  }
  func.func @transform_4(%arg0: i32) -> (i32, i32) {
    %c0_i32 = arith.constant 0 : i32
    %c0_i32_0 = arith.constant 0 : i32
    %c0_i32_1 = arith.constant 0 : i32
    return %c0_i32, %c0_i32_0 : i32, i32
  }
  func.func @transform_5(%arg0: i32) -> (i32, i32) {
    %c0_i32 = arith.constant 0 : i32
    %c0_i32_0 = arith.constant 0 : i32
    %c0_i32_1 = arith.constant 0 : i32
    return %c0_i32, %c0_i32_0 : i32, i32
  }
  func.func @transform_6(%arg0: i32) -> (i32, i32) {
    %c0_i32 = arith.constant 0 : i32
    %c0_i32_0 = arith.constant 0 : i32
    %c0_i32_1 = arith.constant 0 : i32
    return %c0_i32, %c0_i32_0 : i32, i32
  }
  func.func @transform_7(%arg0: i32) -> (i32, i32) {
    %c0_i32 = arith.constant 0 : i32
    %c0_i32_0 = arith.constant 0 : i32
    return %arg0, %c0_i32 : i32, i32
  }
}

</mosaic_0001>

<bundles_post_ra>
// kernel: dense_forward.1
= control target key start
LH: loop header
LB: loop body
LE: loop exit
PB: predicated region body
PF: predicated region fallthrough
CT: control target
= control target key end

     0   :  { %s2837_s24 = smov 0   ;;  %s3577_s0 = inlined_call_operand.vmem [shape: f32[64,256], index: 0, kind: input, shape index: {}]   ;;  %s3578_s1 = inlined_call_operand.vmem [shape: bf16[256,512], index: 1, kind: input, shape index: {}]   ;;  %s3579_s2 = inlined_call_operand.vmem [shape: f32[1,512], index: 2, kind: input, shape index: {}]   ;;  %s3580_s3 = inlined_call_operand.vmem [shape: bf16[512,512], index: 3, kind: input, shape index: {}]   ;;  %s3581_s4 = inlined_call_operand.vmem [shape: f32[1,512], index: 4, kind: input, shape index: {}]   ;;  %s3582_s5 = inlined_call_operand.vmem [shape: bf16[512,128], index: 5, kind: input, shape index: {}]   ;;  %s3583_s6 = inlined_call_operand.vmem [shape: f32[1,128], index: 6, kind: input, shape index: {}]   ;;  %s3584_s7 = inlined_call_operand.vmem [shape: f32[64,128], index: 7, kind: output, shape index: {}]  }
   0x1 LB: > { %s2175_s25 = sadd.s32 4294967295, %s2795_s24   ;;  %p2179_p0 = scmp.ge.s32.totalorder %s2795_s24, 1  ;;  %s2795_s24 = sphi %s2837_s24, %s17_s24  }
   0x2   : > { %p239_p1 = scmp.lt.s32.totalorder %s2795_s24, 5 }
   0x4   : > { %p240_p2 = pnand %p2179_p0, %p239_p1 }
   0x5   : > { %s2180_s21 = sshll.u32 (!%p240_p2), %s2175_s25, 1 }
   0x6   : > { %243 = sbr.rel (%p240_p2) target bundleno = 772 (0x304), region = 48  ;;  %p273_p3 = scmp.lt.s32.totalorder (!%p240_p2), %s2180_s21, 7 }
   0xb   : > { %v2465_v0 = vld [vmem:[%s3578_s1 + $0xe4] ss:$16 sps:$4 sm:$0xff]   ;;  %v2467_v1 = vld [vmem:[%s3578_s1 + $0xec] ss:$16 sps:$4 sm:$0xff]   ;;  %v2469_v2 = vld [vmem:[%s3578_s1 + $0xe0] ss:$16 sps:$4 sm:$0xff]  }
   0xc   : > { %698 = vmatprep.subr.bf16.mxu0 %v2465_v0  ;;  %v2470_v3 = vld [vmem:[%s3578_s1 + $0xe8] ss:$16 sps:$4 sm:$0xff]   ;;  %741 = vmatprep.subr.bf16.mxu1 %v2467_v1  ;;  %v2471_v4 = vld [vmem:[%s3578_s1 + $0xc4] ss:$16 sps:$4 sm:$0xff]   ;;  %v2473_v5 = vld [vmem:[%s3578_s1 + $0xcc] ss:$16 sps:$4 sm:$0xff]  }
   0xd   : > { %699 = vmatpush1.bf16.msra.mxu0 %v2469_v2  ;;  %742 = vmatpush1.bf16.msra.mxu1 %v2470_v3  ;;  %v2475_v6 = vld [vmem:[%s3578_s1 + $0xc0] ss:$16 sps:$4 sm:$0xff]   ;;  %v2476_v7 = vld [vmem:[%s3578_s1 + $0xc8] ss:$16 sps:$4 sm:$0xff]   ;;  %v2477_v8 = vld [vmem:[%s3578_s1 + $0xa4] ss:$16 sps:$4 sm:$0xff]  }
   0xe   : > { %700 = vmatprep.subr.bf16.mxu0 %v2471_v4  ;;  %743 = vmatprep.subr.bf16.mxu1 %v2473_v5  ;;  %v2479_v9 = vld [vmem:[%s3578_s1 + $0xac] ss:$16 sps:$4 sm:$0xff]   ;;  %v2481_v10 = vld [vmem:[%s3578_s1 + $0xa0] ss:$16 sps:$4 sm:$0xff]   ;;  %v2482_v11 = vld [vmem:[%s3578_s1 + $0xa8] ss:$16 sps:$4 sm:$0xff]  }
   0xf   : > { %v2483_v12 = vld [vmem:[%s3578_s1 + $0x84] ss:$16 sps:$4 sm:$0xff]   ;;  %v2485_v13 = vld [vmem:[%s3578_s1 + $0x8c] ss:$16 sps:$4 sm:$0xff]   ;;  %v2487_v14 = vld [vmem:[%s3578_s1 + $0x80] ss:$16 sps:$4 sm:$0xff]  }
  0x10   : > { %v2488_v15 = vld [vmem:[%s3578_s1 + $0x88] ss:$16 sps:$4 sm:$0xff]   ;;  %v2489_v16 = vld [vmem:[%s3578_s1 + $0x64] ss:$16 sps:$4 sm:$0xff]   ;;  %v2491_v17 = vld [vmem:[%s3578_s1 + $0x6c] ss:$16 sps:$4 sm:$0xff]  }
  0x11   : > { %701 = vmatpush1.bf16.msra.mxu0 %v2475_v6  ;;  %744 = vmatpush1.bf16.msra.mxu1 %v2476_v7  ;;  %v2493_v18 = vld [vmem:[%s3578_s1 + $0x60] ss:$16 sps:$4 sm:$0xff]   ;;  %v2494_v19 = vld [vmem:[%s3578_s1 + $0x68] ss:$16 sps:$4 sm:$0xff]   ;;  %v2495_v20 = vld [vmem:[%s3578_s1 + $0x44] ss:$16 sps:$4 sm:$0xff]  }
  0x12   : > { %702 = vmatprep.subr.bf16.mxu0 %v2477_v8  ;;  %745 = vmatprep.subr.bf16.mxu1 %v2479_v9  ;;  %v2497_v21 = vld [vmem:[%s3578_s1 + $0x4c] ss:$16 sps:$4 sm:$0xff]   ;;  %v2499_v22 = vld [vmem:[%s3578_s1 + $0x40] ss:$16 sps:$4 sm:$0xff]   ;;  %v2500_v23 = vld [vmem:[%s3578_s1 + $0x48] ss:$16 sps:$4 sm:$0xff]  }
  0x13   : > { %v2501_v24 = vld [vmem:[%s3578_s1 + $0x24] ss:$16 sps:$4 sm:$0xff]   ;;  %v2503_v25 = vld [vmem:[%s3578_s1 + $0x2c] ss:$16 sps:$4 sm:$0xff]   ;;  %v2505_v26 = vld [vmem:[%s3578_s1 + $0x20] ss:$16 sps:$4 sm:$0xff]  }
  0x14   : > { %v2506_v27 = vld [vmem:[%s3578_s1 + $0x28] ss:$16 sps:$4 sm:$0xff]   ;;  %v2507_v28 = vld [vmem:[%s3578_s1 + $0x4] ss:$16 sps:$4 sm:$0xff]   ;;  %v2509_v29 = vld [vmem:[%s3578_s1 + $0xc] ss:$16 sps:$4 sm:$0xff]  }
  0x15   : > { %703 = vmatpush1.bf16.msra.mxu0 %v2481_v10  ;;  %746 = vmatpush1.bf16.msra.mxu1 %v2482_v11  ;;  %v2511_v30 = vld [vmem:[%s3578_s1] ss:$16 sps:$4 sm:$0xff]   ;;  %v2512_v31 = vld [vmem:[%s3578_s1 + $0x8] ss:$16 sps:$4 sm:$0xff]   ;;  %v2513_v32 = vld [vmem:[%s3578_s1 + $0x1e4] ss:$16 sps:$4 sm:$0xff]  }
  0x16   : > { %704 = vmatprep.subr.bf16.mxu0 %v2483_v12  ;;  %747 = vmatprep.subr.bf16.mxu1 %v2485_v13  ;;  %v2515_v33 = vld [vmem:[%s3578_s1 + $0x1ec] ss:$16 sps:$4 sm:$0xff]   ;;  %v2517_v34 = vld [vmem:[%s3578_s1 + $0x1e0] ss:$16 sps:$4 sm:$0xff]   ;;  %v2518_v35 = vld [vmem:[%s3578_s1 + $0x1e8] ss:$16 sps:$4 sm:$0xff]  }
  0x17   : > { %v2519_v36 = vld [vmem:[%s3578_s1 + $0x1c4] ss:$16 sps:$4 sm:$0xff]   ;;  %s3586_s21 = smov (!%p273_p3, %s2180_s21), 7  ;;  %v2521_v37 = vld [vmem:[%s3578_s1 + $0x1cc] ss:$16 sps:$4 sm:$0xff]  }
  0x18   : > { %v2523_v38 = vld [vmem:[%s3578_s1 + $0x1c0] ss:$16 sps:$4 sm:$0xff]   ;;  %v2524_v39 = vld [vmem:[%s3578_s1 + $0x1c8] ss:$16 sps:$4 sm:$0xff]   ;;  %v2525_v40 = vld [vmem:[%s3578_s1 + $0x1a4] ss:$16 sps:$4 sm:$0xff]  }
  0x19   : > { %705 = vmatpush1.bf16.msra.mxu0 %v2487_v14  ;;  %748 = vmatpush1.bf16.msra.mxu1 %v2488_v15  ;;  %s2412_s23 = sshll.u32 %s3586_s21, 4  ;;  %v2527_v41 = vld [vmem:[%s3578_s1 + $0x1ac] ss:$16 sps:$4 sm:$0xff]   ;;  %v2529_v42 = vld [vmem:[%s3578_s1 + $0x1a0] ss:$16 sps:$4 sm:$0xff]   ;;  %s2184_s22 = sshll.u32 %s3586_s21, 3 }
  0x1a   : > { %706 = vmatprep.subr.bf16.mxu0 %v2489_v16  ;;  %749 = vmatprep.subr.bf16.mxu1 %v2491_v17  ;;  %v2530_v43 = vld [vmem:[%s3578_s1 + $0x1a8] ss:$16 sps:$4 sm:$0xff]   ;;  %s2985_s10 = scalar_lea.vmem %s3577_s0, %s2412_s23  ;;  %v2531_v44 = vld [vmem:[%s3578_s1 + $0x184] ss:$16 sps:$4 sm:$0xff]   ;;  %v2533_v45 = vld [vmem:[%s3578_s1 + $0x18c] ss:$16 sps:$4 sm:$0xff]   ;;  %s283_s27 = scalar_lea.vmem %s3584_s7, %s2184_s22 }
  0x1b   : > { %v287_v46 = vld [vmem:[%s2985_s10 + $0x8] sm:$0xff]  ;;  %v2535_v47 = vld [vmem:[%s3578_s1 + $0x180] ss:$16 sps:$4 sm:$0xff]   ;;  %v289_v49 = vld [vmem:[%s2985_s10 + $0x18] sm:$0xff] }
  0x1c   : > { %v2536_v48 = vld [vmem:[%s3578_s1 + $0x188] ss:$16 sps:$4 sm:$0xff]   ;;  %v2537_v50 = vld [vmem:[%s3578_s1 + $0x164] ss:$16 sps:$4 sm:$0xff]   ;;  %v291_v51 = vpack.c.bf16 %v289_v49, %v287_v46  ;;  %v2539_v52 = vld [vmem:[%s3578_s1 + $0x16c] ss:$16 sps:$4 sm:$0xff]  }
  0x1d   : > { %707 = vmatpush1.bf16.msra.mxu0 %v2493_v18  ;;  %750 = vmatpush1.bf16.msra.mxu1 %v2494_v19  ;;  %v2541_v53 = vld [vmem:[%s3578_s1 + $0x160] ss:$16 sps:$4 sm:$0xff]   ;;  %v2542_v54 = vld [vmem:[%s3578_s1 + $0x168] ss:$16 sps:$4 sm:$0xff]   ;;  %v2543_v55 = vld [vmem:[%s3578_s1 + $0x144] ss:$16 sps:$4 sm:$0xff]  }
  0x1e   : > { %708 = vmatprep.subr.bf16.mxu0 %v2495_v20  ;;  %751 = vmatprep.subr.bf16.mxu1 %v2497_v21  ;;  %v2545_v56 = vld [vmem:[%s3578_s1 + $0x14c] ss:$16 sps:$4 sm:$0xff]   ;;  %v2547_v57 = vld [vmem:[%s3578_s1 + $0x140] ss:$16 sps:$4 sm:$0xff]   ;;  %v2548_v58 = vld [vmem:[%s3578_s1 + $0x148] ss:$16 sps:$4 sm:$0xff]  }
  0x1f   : > { %730 = vmatprep.mubr.bf16.mxu0 %v291_v51  ;;  %773 = vmatprep.mubr.bf16.mxu1 %v291_v51  ;;  %v2549_v59 = vld [vmem:[%s3578_s1 + $0x124] ss:$16 sps:$4 sm:$0xff]   ;;  %v2551_v60 = vld [vmem:[%s3578_s1 + $0x12c] ss:$16 sps:$4 sm:$0xff]   ;;  %v2553_v61 = vld [vmem:[%s3578_s1 + $0x120] ss:$16 sps:$4 sm:$0xff]  }
  0x20   : > { %v2554_v62 = vld [vmem:[%s3578_s1 + $0x128] ss:$16 sps:$4 sm:$0xff]   ;;  %v2555_v63 = vld [vmem:[%s3578_s1 + $0x104] ss:$16 sps:$4 sm:$0xff]   ;;  %v2557_v0 = vld [vmem:[%s3578_s1 + $0x10c] ss:$16 sps:$4 sm:$0xff]  }
  0x21   : > { %709 = vmatpush1.bf16.msra.mxu0 %v2499_v22  ;;  %752 = vmatpush1.bf16.msra.mxu1 %v2500_v23  ;;  %v2559_v1 = vld [vmem:[%s3578_s1 + $0x100] ss:$16 sps:$4 sm:$0xff]   ;;  %v2560_v2 = vld [vmem:[%s3578_s1 + $0x108] ss:$16 sps:$4 sm:$0xff]   ;;  %v2563_v5 = vld [vmem:[%s3580_s3 + $0xe4] ss:$16 sps:$4 sm:$0xff]  }
  0x22   : > { %710 = vmatprep.subr.bf16.mxu0 %v2501_v24  ;;  %753 = vmatprep.subr.bf16.mxu1 %v2503_v25  ;;  %v286_v3 = vld [vmem:[%s2985_s10] sm:$0xff]  ;;  %v288_v4 = vld [vmem:[%s2985_s10 + $0x10] sm:$0xff] }
  0x23   : > { %v2566_v6 = vld [vmem:[%s3580_s3 + $0x2e4] ss:$16 sps:$4 sm:$0xff]   ;;  %v290_v7 = vpack.c.bf16 %v288_v4, %v286_v3  ;;  %v2561_v8 = vld [vmem:[%s3580_s3 + $0xe0] ss:$16 sps:$4 sm:$0xff]  }
  0x24   : > { %v2564_v9 = vld [vmem:[%s3580_s3 + $0x2e0] ss:$16 sps:$4 sm:$0xff]   ;;  %v2569_v10 = vld [vmem:[%s3580_s3 + $0xc4] ss:$16 sps:$4 sm:$0xff]  }
  0x25   : > { %711 = vmatpush1.bf16.msra.mxu0 %v2505_v26  ;;  %754 = vmatpush1.bf16.msra.mxu1 %v2506_v27  ;;  %v2572_v11 = vld [vmem:[%s3580_s3 + $0x2c4] ss:$16 sps:$4 sm:$0xff]   ;;  %v2567_v12 = vld [vmem:[%s3580_s3 + $0xc0] ss:$16 sps:$4 sm:$0xff]  }
  0x26   : > { %712 = vmatprep.subr.bf16.mxu0 %v2507_v28  ;;  %755 = vmatprep.subr.bf16.mxu1 %v2509_v29  ;;  %v2570_v13 = vld [vmem:[%s3580_s3 + $0x2c0] ss:$16 sps:$4 sm:$0xff]   ;;  %v2575_v14 = vld [vmem:[%s3580_s3 + $0xa4] ss:$16 sps:$4 sm:$0xff]  }
  0x27   : > { %v2578_v15 = vld [vmem:[%s3580_s3 + $0x2a4] ss:$16 sps:$4 sm:$0xff]   ;;  %v2573_v16 = vld [vmem:[%s3580_s3 + $0xa0] ss:$16 sps:$4 sm:$0xff]  }
  0x28   : > { %v2576_v17 = vld [vmem:[%s3580_s3 + $0x2a0] ss:$16 sps:$4 sm:$0xff]   ;;  %v2581_v18 = vld [vmem:[%s3580_s3 + $0x84] ss:$16 sps:$4 sm:$0xff]  }
  0x29   : > { %713 = vmatpush1.bf16.msra.mxu0 %v2511_v30  ;;  %756 = vmatpush1.bf16.msra.mxu1 %v2512_v31  ;;  %v2584_v19 = vld [vmem:[%s3580_s3 + $0x284] ss:$16 sps:$4 sm:$0xff]   ;;  %v2579_v20 = vld [vmem:[%s3580_s3 + $0x80] ss:$16 sps:$4 sm:$0xff]  }
  0x2a   : > { %714 = vmatprep.subr.bf16.mxu0 %v2513_v32  ;;  %757 = vmatprep.subr.bf16.mxu1 %v2515_v33  ;;  %v2582_v21 = vld [vmem:[%s3580_s3 + $0x280] ss:$16 sps:$4 sm:$0xff]   ;;  %v2587_v22 = vld [vmem:[%s3580_s3 + $0x64] ss:$16 sps:$4 sm:$0xff]  }
  0x2b   : > { %v2590_v23 = vld [vmem:[%s3580_s3 + $0x264] ss:$16 sps:$4 sm:$0xff]   ;;  %v2585_v24 = vld [vmem:[%s3580_s3 + $0x60] ss:$16 sps:$4 sm:$0xff]  }
  0x2c   : > { %v2588_v25 = vld [vmem:[%s3580_s3 + $0x260] ss:$16 sps:$4 sm:$0xff]   ;;  %v2593_v26 = vld [vmem:[%s3580_s3 + $0x44] ss:$16 sps:$4 sm:$0xff]  }
  0x2d   : > { %715 = vmatpush2.bf16.msra.mxu0 %v2517_v34  ;;  %758 = vmatpush2.bf16.msra.mxu1 %v2518_v35  ;;  %v2596_v27 = vld [vmem:[%s3580_s3 + $0x244] ss:$16 sps:$4 sm:$0xff]   ;;  %v2591_v28 = vld [vmem:[%s3580_s3 + $0x40] ss:$16 sps:$4 sm:$0xff]  }
  0x2e   : > { %716 = vmatprep.subr.bf16.mxu0 %v2519_v36  ;;  %759 = vmatprep.subr.bf16.mxu1 %v2521_v37  ;;  %v2594_v29 = vld [vmem:[%s3580_s3 + $0x240] ss:$16 sps:$4 sm:$0xff]   ;;  %v2599_v30 = vld [vmem:[%s3580_s3 + $0x24] ss:$16 sps:$4 sm:$0xff]  }
  0x2f   : > { %v2602_v31 = vld [vmem:[%s3580_s3 + $0x224] ss:$16 sps:$4 sm:$0xff]   ;;  %v2597_v32 = vld [vmem:[%s3580_s3 + $0x20] ss:$16 sps:$4 sm:$0xff]  }
  0x30   : > { %v2600_v33 = vld [vmem:[%s3580_s3 + $0x220] ss:$16 sps:$4 sm:$0xff]   ;;  %v2605_v34 = vld [vmem:[%s3580_s3 + $0x4] ss:$16 sps:$4 sm:$0xff]  }
  0x31   : > { %717 = vmatpush2.bf16.msra.mxu0 %v2523_v38  ;;  %760 = vmatpush2.bf16.msra.mxu1 %v2524_v39  ;;  %v2608_v35 = vld [vmem:[%s3580_s3 + $0x204] ss:$16 sps:$4 sm:$0xff]   ;;  %v2603_v36 = vld [vmem:[%s3580_s3] ss:$16 sps:$4 sm:$0xff]  }
  0x32   : > { %718 = vmatprep.subr.bf16.mxu0 %v2525_v40  ;;  %761 = vmatprep.subr.bf16.mxu1 %v2527_v41  ;;  %v2606_v37 = vld [vmem:[%s3580_s3 + $0x200] ss:$16 sps:$4 sm:$0xff]   ;;  %v2611_v38 = vld [vmem:[%s3580_s3 + $0x1e4] ss:$16 sps:$4 sm:$0xff]  }
  0x33   : > { %v2614_v39 = vld [vmem:[%s3580_s3 + $0x3e4] ss:$16 sps:$4 sm:$0xff]   ;;  %v2609_v40 = vld [vmem:[%s3580_s3 + $0x1e0] ss:$16 sps:$4 sm:$0xff]  }
  0x34   : > { %v2612_v41 = vld [vmem:[%s3580_s3 + $0x3e0] ss:$16 sps:$4 sm:$0xff]   ;;  %v2623_v46 = vld [vmem:[%s3580_s3 + $0x1a4] ss:$16 sps:$4 sm:$0xff]  }
  0x35   : > { %719 = vmatpush2.bf16.msra.mxu0 %v2529_v42  ;;  %762 = vmatpush2.bf16.msra.mxu1 %v2530_v43  ;;  %v2617_v42 = vld [vmem:[%s3580_s3 + $0x1c4] ss:$16 sps:$4 sm:$0xff]   ;;  %v2624_v49 = vld [vmem:[%s3580_s3 + $0x3a0] ss:$16 sps:$4 sm:$0xff]  }
  0x36   : > { %720 = vmatprep.subr.bf16.mxu0 %v2531_v44  ;;  %763 = vmatprep.subr.bf16.mxu1 %v2533_v45  ;;  %v2620_v43 = vld [vmem:[%s3580_s3 + $0x3c4] ss:$16 sps:$4 sm:$0xff]   ;;  %v2615_v44 = vld [vmem:[%s3580_s3 + $0x1c0] ss:$16 sps:$4 sm:$0xff]  }
  0x37   : > { %v2618_v45 = vld [vmem:[%s3580_s3 + $0x3c0] ss:$16 sps:$4 sm:$0xff]   ;;  %v2632_v51 = vld [vmem:[%s3580_s3 + $0x384] ss:$16 sps:$4 sm:$0xff]  }
  0x38   : > { %v2656_v3 = vld [vmem:[%s3580_s3 + $0x304] ss:$16 sps:$4 sm:$0xff]   ;;  %v2651_v4 = vld [vmem:[%s3580_s3 + $0x100] ss:$16 sps:$4 sm:$0xff]  }
  0x39   : > { %721 = vmatpush2.bf16.msra.mxu0 %v2535_v47  ;;  %764 = vmatpush2.bf16.msra.mxu1 %v2536_v48  ;;  %v2626_v47 = vld [vmem:[%s3580_s3 + $0x3a4] ss:$16 sps:$4 sm:$0xff]   ;;  %v2621_v48 = vld [vmem:[%s3580_s3 + $0x1a0] ss:$16 sps:$4 sm:$0xff]  }
  0x3a   : > { %722 = vmatprep.subr.bf16.mxu0 %v2537_v50  ;;  %765 = vmatprep.subr.bf16.mxu1 %v2539_v52  ;;  %v2629_v50 = vld [vmem:[%s3580_s3 + $0x184] ss:$16 sps:$4 sm:$0xff]   ;;  %v2627_v52 = vld [vmem:[%s3580_s3 + $0x180] ss:$16 sps:$4 sm:$0xff]  }
  0x3d   : > { %723 = vmatpush2.bf16.msra.mxu0 %v2541_v53  ;;  %766 = vmatpush2.bf16.msra.mxu1 %v2542_v54  ;;  %v2630_v53 = vld [vmem:[%s3580_s3 + $0x380] ss:$16 sps:$4 sm:$0xff]   ;;  %v2635_v54 = vld [vmem:[%s3580_s3 + $0x164] ss:$16 sps:$4 sm:$0xff]  }
  0x3e   : > { %724 = vmatprep.subr.bf16.mxu0 %v2543_v55  ;;  %767 = vmatprep.subr.bf16.mxu1 %v2545_v56  ;;  %v2638_v55 = vld [vmem:[%s3580_s3 + $0x364] ss:$16 sps:$4 sm:$0xff]   ;;  %v2633_v56 = vld [vmem:[%s3580_s3 + $0x160] ss:$16 sps:$4 sm:$0xff]  }
  0x41   : > { %725 = vmatpush2.bf16.msra.mxu0 %v2547_v57  ;;  %768 = vmatpush2.bf16.msra.mxu1 %v2548_v58  ;;  %v2636_v57 = vld [vmem:[%s3580_s3 + $0x360] ss:$16 sps:$4 sm:$0xff]   ;;  %v2641_v58 = vld [vmem:[%s3580_s3 + $0x144] ss:$16 sps:$4 sm:$0xff]  }
  0x42   : > { %726 = vmatprep.subr.bf16.mxu0 %v2549_v59  ;;  %769 = vmatprep.subr.bf16.mxu1 %v2551_v60  ;;  %v2644_v59 = vld [vmem:[%s3580_s3 + $0x344] ss:$16 sps:$4 sm:$0xff]   ;;  %v2639_v60 = vld [vmem:[%s3580_s3 + $0x140] ss:$16 sps:$4 sm:$0xff]  }
  0x45   : > { %727 = vmatpush2.bf16.msra.mxu0 %v2553_v61  ;;  %770 = vmatpush2.bf16.msra.mxu1 %v2554_v62  ;;  %v2642_v61 = vld [vmem:[%s3580_s3 + $0x340] ss:$16 sps:$4 sm:$0xff]   ;;  %v2647_v62 = vld [vmem:[%s3580_s3 + $0x124] ss:$16 sps:$4 sm:$0xff]  }
  0x46   : > { %728 = vmatprep.subr.bf16.mxu0 %v2555_v63  ;;  %771 = vmatprep.subr.bf16.mxu1 %v2557_v0  ;;  %v2650_v63 = vld [vmem:[%s3580_s3 + $0x324] ss:$16 sps:$4 sm:$0xff]   ;;  %v2645_v0 = vld [vmem:[%s3580_s3 + $0x120] ss:$16 sps:$4 sm:$0xff]  }
  0x49   : > { %729 = vmatpush2.bf16.msra.mxu0 %v2559_v1  ;;  %772 = vmatpush2.bf16.msra.mxu1 %v2560_v2  ;;  %v2648_v1 = vld [vmem:[%s3580_s3 + $0x320] ss:$16 sps:$4 sm:$0xff]   ;;  %v2653_v2 = vld [vmem:[%s3580_s3 + $0x104] ss:$16 sps:$4 sm:$0xff]  }
  0x4a   : > { %1586 = vmatprep.subr.bf16.mxu0 %v2563_v5  ;;  %1629 = vmatprep.subr.bf16.mxu1 %v2566_v6  ;;  %v2654_v5 = vld [vmem:[%s3580_s3 + $0x300] ss:$16 sps:$4 sm:$0xff]   ;;  %v2659_v6 = vld [vmem:[%s3580_s3 + $0xec] ss:$16 sps:$4 sm:$0xff]  }
  0x4c   : > { %731 = vmatmul.mubr.bf16.vlgmr.msra.gmra.mxu0 %v290_v7  ;;  %774 = vmatmul.mubr.bf16.vlgmr.msra.gmra.mxu1 %v290_v7  ;;  %v2662_v7 = vld [vmem:[%s3580_s3 + $0x2ec] ss:$16 sps:$4 sm:$0xff]  }
  0x4d   : > { %1587 = vmatpush1.bf16.msra.mxu0 %v2561_v8  ;;  %1630 = vmatpush1.bf16.msra.mxu1 %v2564_v9  ;;  %v358_v8 = vlaneseq }
  0x4e   : > { %1588 = vmatprep.subr.bf16.mxu0 %v2569_v10  ;;  %1631 = vmatprep.subr.bf16.mxu1 %v2572_v11 }
  0x4f   : > { %v3249_v9 = vshrl.u32 %v358_v8, 7  ;;  %v2696_v8 = vld [vmem:[%s3580_s3 + $0x228] ss:$16 sps:$4 sm:$0xff]  }
  0x51   : > { %1589 = vmatpush1.bf16.msra.mxu0 %v2567_v12  ;;  %1632 = vmatpush1.bf16.msra.mxu1 %v2570_v13  ;;  %v364_v10 = vsub.s32 1, %v3249_v9  ;;  %v372_v11 = vsub.s32 3, %v3249_v9  ;;  %v360_v12 = vsub.s32 0, %v3249_v9  ;;  %v368_v13 = vsub.s32 2, %v3249_v9 }
  0x52   : > { %1590 = vmatprep.subr.bf16.mxu0 %v2575_v14  ;;  %1633 = vmatprep.subr.bf16.mxu1 %v2578_v15  ;;  %v356_v14 = vld [vmem:[%s3579_s2] sm:$0xf] }
  0x55   : > { %1591 = vmatpush1.bf16.msra.mxu0 %v2573_v16  ;;  %1634 = vmatpush1.bf16.msra.mxu1 %v2576_v17  ;;  %v365_v17 = vrot.slane %v356_v14, %v364_v10 }
  0x56   : > { %1592 = vmatprep.subr.bf16.mxu0 %v2581_v18  ;;  %1635 = vmatprep.subr.bf16.mxu1 %v2584_v19  ;;  %v373_v18 = vrot.slane %v356_v14, %v372_v11  ;;  %v361_v19 = vrot.slane %v356_v14, %v360_v12 }
  0x59   : > { %1593 = vmatpush1.bf16.msra.mxu0 %v2579_v20  ;;  %1636 = vmatpush1.bf16.msra.mxu1 %v2582_v21  ;;  %v369_v20 = vrot.slane %v356_v14, %v368_v13  ;;  %v2701_v14 = vld [vmem:[%s3580_s3 + $0xc] ss:$16 sps:$4 sm:$0xff]  }
  0x5a   : > { %1594 = vmatprep.subr.bf16.mxu0 %v2587_v22  ;;  %1637 = vmatprep.subr.bf16.mxu1 %v2590_v23 }
  0x5d   : > { %1595 = vmatpush1.bf16.msra.mxu0 %v2585_v24  ;;  %1638 = vmatpush1.bf16.msra.mxu1 %v2588_v25 }
  0x5e   : > { %1596 = vmatprep.subr.bf16.mxu0 %v2593_v26  ;;  %1639 = vmatprep.subr.bf16.mxu1 %v2596_v27 }
  0x61   : > { %1597 = vmatpush1.bf16.msra.mxu0 %v2591_v28  ;;  %1640 = vmatpush1.bf16.msra.mxu1 %v2594_v29 }
  0x62   : > { %1598 = vmatprep.subr.bf16.mxu0 %v2599_v30  ;;  %1641 = vmatprep.subr.bf16.mxu1 %v2602_v31 }
  0x65   : > { %1599 = vmatpush1.bf16.msra.mxu0 %v2597_v32  ;;  %1642 = vmatpush1.bf16.msra.mxu1 %v2600_v33 }
  0x66   : > { %1600 = vmatprep.subr.bf16.mxu0 %v2605_v34  ;;  %1643 = vmatprep.subr.bf16.mxu1 %v2608_v35 }
  0x69   : > { %1601 = vmatpush1.bf16.msra.mxu0 %v2603_v36  ;;  %1644 = vmatpush1.bf16.msra.mxu1 %v2606_v37 }
  0x6a   : > { %1602 = vmatprep.subr.bf16.mxu0 %v2611_v38  ;;  %1645 = vmatprep.subr.bf16.mxu1 %v2614_v39 }
  0x6d   : > { %1603 = vmatpush2.bf16.msra.mxu0 %v2609_v40  ;;  %1646 = vmatpush2.bf16.msra.mxu1 %v2612_v41 }
  0x6e   : > { %1604 = vmatprep.subr.bf16.mxu0 %v2617_v42  ;;  %1647 = vmatprep.subr.bf16.mxu1 %v2620_v43 }
  0x71   : > { %1605 = vmatpush2.bf16.msra.mxu0 %v2615_v44  ;;  %1648 = vmatpush2.bf16.msra.mxu1 %v2618_v45  ;;  %v2657_v45 = vld [vmem:[%s3580_s3 + $0xe8] ss:$16 sps:$4 sm:$0xff]  }
  0x72   : > { %1606 = vmatprep.subr.bf16.mxu0 %v2623_v46  ;;  %1649 = vmatprep.subr.bf16.mxu1 %v2626_v47  ;;  %v2660_v46 = vld [vmem:[%s3580_s3 + $0x2e8] ss:$16 sps:$4 sm:$0xff]  }
  0x75   : > { %1607 = vmatpush2.bf16.msra.mxu0 %v2621_v48  ;;  %1650 = vmatpush2.bf16.msra.mxu1 %v2624_v49  ;;  %v2665_v49 = vld [vmem:[%s3580_s3 + $0xcc] ss:$16 sps:$4 sm:$0xff]  }
  0x76   : > { %1608 = vmatprep.subr.bf16.mxu0 %v2629_v50  ;;  %1651 = vmatprep.subr.bf16.mxu1 %v2632_v51  ;;  %v2668_v50 = vld [vmem:[%s3580_s3 + $0x2cc] ss:$16 sps:$4 sm:$0xff]   ;;  %v2663_v51 = vld [vmem:[%s3580_s3 + $0xc8] ss:$16 sps:$4 sm:$0xff]  }
  0x79   : > { %1609 = vmatpush2.bf16.msra.mxu0 %v2627_v52  ;;  %1652 = vmatpush2.bf16.msra.mxu1 %v2630_v53  ;;  %v2666_v52 = vld [vmem:[%s3580_s3 + $0x2c8] ss:$16 sps:$4 sm:$0xff]   ;;  %v2671_v53 = vld [vmem:[%s3580_s3 + $0xac] ss:$16 sps:$4 sm:$0xff]  }
  0x7a   : > { %1610 = vmatprep.subr.bf16.mxu0 %v2635_v54  ;;  %1653 = vmatprep.subr.bf16.mxu1 %v2638_v55  ;;  %v2674_v54 = vld [vmem:[%s3580_s3 + $0x2ac] ss:$16 sps:$4 sm:$0xff]   ;;  %v2669_v55 = vld [vmem:[%s3580_s3 + $0xa8] ss:$16 sps:$4 sm:$0xff]  }
  0x7d   : > { %1611 = vmatpush2.bf16.msra.mxu0 %v2633_v56  ;;  %1654 = vmatpush2.bf16.msra.mxu1 %v2636_v57  ;;  %v2672_v56 = vld [vmem:[%s3580_s3 + $0x2a8] ss:$16 sps:$4 sm:$0xff]   ;;  %v2677_v57 = vld [vmem:[%s3580_s3 + $0x8c] ss:$16 sps:$4 sm:$0xff]  }
  0x7e   : > { %1612 = vmatprep.subr.bf16.mxu0 %v2641_v58  ;;  %1655 = vmatprep.subr.bf16.mxu1 %v2644_v59  ;;  %v2680_v58 = vld [vmem:[%s3580_s3 + $0x28c] ss:$16 sps:$4 sm:$0xff]   ;;  %v2675_v59 = vld [vmem:[%s3580_s3 + $0x88] ss:$16 sps:$4 sm:$0xff]  }
  0x81   : > { %1613 = vmatpush2.bf16.msra.mxu0 %v2639_v60  ;;  %1656 = vmatpush2.bf16.msra.mxu1 %v2642_v61  ;;  %v2678_v60 = vld [vmem:[%s3580_s3 + $0x288] ss:$16 sps:$4 sm:$0xff]   ;;  %v2683_v61 = vld [vmem:[%s3580_s3 + $0x6c] ss:$16 sps:$4 sm:$0xff]  }
  0x82   : > { %1614 = vmatprep.subr.bf16.mxu0 %v2647_v62  ;;  %1657 = vmatprep.subr.bf16.mxu1 %v2650_v63  ;;  %v2686_v62 = vld [vmem:[%s3580_s3 + $0x26c] ss:$16 sps:$4 sm:$0xff]   ;;  %v2681_v63 = vld [vmem:[%s3580_s3 + $0x68] ss:$16 sps:$4 sm:$0xff]  }
  0x85   : > { %1615 = vmatpush2.bf16.msra.mxu0 %v2645_v0  ;;  %1658 = vmatpush2.bf16.msra.mxu1 %v2648_v1  ;;  %v2684_v0 = vld [vmem:[%s3580_s3 + $0x268] ss:$16 sps:$4 sm:$0xff]   ;;  %v2689_v1 = vld [vmem:[%s3580_s3 + $0x4c] ss:$16 sps:$4 sm:$0xff]  }
  0x86   : > { %1616 = vmatprep.subr.bf16.mxu0 %v2653_v2  ;;  %1659 = vmatprep.subr.bf16.mxu1 %v2656_v3  ;;  %v2692_v2 = vld [vmem:[%s3580_s3 + $0x24c] ss:$16 sps:$4 sm:$0xff]   ;;  %v2687_v3 = vld [vmem:[%s3580_s3 + $0x48] ss:$16 sps:$4 sm:$0xff]  }
  0x89   : > { %1617 = vmatpush2.bf16.msra.mxu0 %v2651_v4  ;;  %1660 = vmatpush2.bf16.msra.mxu1 %v2654_v5  ;;  %v2690_v4 = vld [vmem:[%s3580_s3 + $0x248] ss:$16 sps:$4 sm:$0xff]   ;;  %v2695_v5 = vld [vmem:[%s3580_s3 + $0x2c] ss:$16 sps:$4 sm:$0xff]  }
  0x8a   : > { %1672 = vmatprep.subr.bf16.mxu0 %v2659_v6  ;;  %1715 = vmatprep.subr.bf16.mxu1 %v2662_v7  ;;  %v2698_v6 = vld [vmem:[%s3580_s3 + $0x22c] ss:$16 sps:$4 sm:$0xff]   ;;  %v2693_v7 = vld [vmem:[%s3580_s3 + $0x28] ss:$16 sps:$4 sm:$0xff]  }
 0x10c   : > { %v732_v15 = vpop.f32.mrf.mxu0  ;;  %v775_v16 = vpop.f32.mrf.mxu1 }
 0x10d   : > { %v733_v29 = vadd.f32 %v732_v15, %v361_v19  ;;  %v776_v30 = vadd.f32 %v775_v16, %v369_v20  ;;  %v2704_v15 = vld [vmem:[%s3580_s3 + $0x20c] ss:$16 sps:$4 sm:$0xff]   ;;  %v2699_v16 = vld [vmem:[%s3580_s3 + $0x8] ss:$16 sps:$4 sm:$0xff]  }
 0x10e   : > { %v734_v21 = vpop.f32.mrf.mxu0  ;;  %v777_v22 = vpop.f32.mrf.mxu1 }
 0x10f   : > { %v735_v25 = vadd.f32 %v734_v21, %v365_v17  ;;  %v778_v26 = vadd.f32 %v777_v22, %v373_v18  ;;  %v784_v41 = vmax.f32 %v733_v29, 0.0  ;;  %v786_v42 = vmax.f32 %v776_v30, 0.0  ;;  %v2708_v21 = vld [vmem:[%s3580_s3 + $0x3e8] ss:$16 sps:$4 sm:$0xff]   ;;  %v2713_v22 = vld [vmem:[%s3580_s3 + $0x1cc] ss:$16 sps:$4 sm:$0xff]  }
 0x110   : > { %v736_v23 = vpop.f32.mrf.mxu0  ;;  %v779_v24 = vpop.f32.mrf.mxu1  ;;  %v2720_v29 = vld [vmem:[%s3580_s3 + $0x3a8] ss:$16 sps:$4 sm:$0xff]   ;;  %v2725_v30 = vld [vmem:[%s3580_s3 + $0x18c] ss:$16 sps:$4 sm:$0xff]  }
 0x111   : > { %v737_v27 = vadd.f32 %v736_v23, %v361_v19  ;;  %v780_v28 = vadd.f32 %v779_v24, %v369_v20  ;;  %v785_v37 = vmax.f32 %v735_v25, 0.0  ;;  %v787_v38 = vmax.f32 %v778_v26, 0.0  ;;  %v2710_v19 = vld [vmem:[%s3580_s3 + $0x3ec] ss:$16 sps:$4 sm:$0xff]   ;;  %v2705_v20 = vld [vmem:[%s3580_s3 + $0x1e8] ss:$16 sps:$4 sm:$0xff]  }
 0x112   : > { %v738_v31 = vpop.f32.mrf.mxu0  ;;  %v781_v32 = vpop.f32.mrf.mxu1  ;;  %v2716_v23 = vld [vmem:[%s3580_s3 + $0x3cc] ss:$16 sps:$4 sm:$0xff]   ;;  %v2711_v24 = vld [vmem:[%s3580_s3 + $0x1c8] ss:$16 sps:$4 sm:$0xff]  }
 0x113   : > { %v739_v33 = vadd.f32 %v738_v31, %v365_v17  ;;  %v782_v34 = vadd.f32 %v781_v32, %v373_v18  ;;  %v788_v35 = vmax.f32 %v737_v27, 0.0  ;;  %v790_v36 = vmax.f32 %v780_v28, 0.0  ;;  %v2702_v17 = vld [vmem:[%s3580_s3 + $0x208] ss:$16 sps:$4 sm:$0xff]   ;;  %v2707_v18 = vld [vmem:[%s3580_s3 + $0x1ec] ss:$16 sps:$4 sm:$0xff]  }
 0x114   : > { %v2714_v25 = vld [vmem:[%s3580_s3 + $0x3c8] ss:$16 sps:$4 sm:$0xff]   ;;  %v2719_v26 = vld [vmem:[%s3580_s3 + $0x1ac] ss:$16 sps:$4 sm:$0xff]  }
 0x115   : > { %v789_v39 = vmax.f32 %v739_v33, 0.0  ;;  %v791_v40 = vmax.f32 %v782_v34, 0.0  ;;  %v3272_v47 = vpack.c.bf16 %v788_v35, %v784_v41  ;;  %v3274_v48 = vpack.c.bf16 %v790_v36, %v786_v42  ;;  %v2722_v27 = vld [vmem:[%s3580_s3 + $0x3ac] ss:$16 sps:$4 sm:$0xff]   ;;  %v2717_v28 = vld [vmem:[%s3580_s3 + $0x1a8] ss:$16 sps:$4 sm:$0xff]  }
 0x116   : > { %v2728_v31 = vld [vmem:[%s3580_s3 + $0x38c] ss:$16 sps:$4 sm:$0xff]   ;;  %v2723_v32 = vld [vmem:[%s3580_s3 + $0x188] ss:$16 sps:$4 sm:$0xff]  }
 0x117   : > { %v793_v43 = vpack.c.bf16 %v789_v39, %v785_v37  ;;  %v795_v44 = vpack.c.bf16 %v791_v40, %v787_v38  ;;  %v2726_v33 = vld [vmem:[%s3580_s3 + $0x388] ss:$16 sps:$4 sm:$0xff]   ;;  %v2731_v34 = vld [vmem:[%s3580_s3 + $0x16c] ss:$16 sps:$4 sm:$0xff]  }
 0x118   : > { %v2734_v35 = vld [vmem:[%s3580_s3 + $0x36c] ss:$16 sps:$4 sm:$0xff]   ;;  %v2729_v36 = vld [vmem:[%s3580_s3 + $0x168] ss:$16 sps:$4 sm:$0xff]  }
 0x119   : > { %1618 = vmatprep.mubr.bf16.mxu0 %v793_v43  ;;  %1661 = vmatprep.mubr.bf16.mxu1 %v795_v44  ;;  %v2732_v37 = vld [vmem:[%s3580_s3 + $0x368] ss:$16 sps:$4 sm:$0xff]   ;;  %v2737_v38 = vld [vmem:[%s3580_s3 + $0x14c] ss:$16 sps:$4 sm:$0xff]  }
 0x11a   : > { %1619 = vmatmul.mubr.bf16.vlgmr.msra.gmra.mxu0 %v3272_v47  ;;  %1662 = vmatmul.mubr.bf16.vlgmr.msra.gmra.mxu1 %v3274_v48  ;;  %v2740_v39 = vld [vmem:[%s3580_s3 + $0x34c] ss:$16 sps:$4 sm:$0xff]   ;;  %v2735_v40 = vld [vmem:[%s3580_s3 + $0x148] ss:$16 sps:$4 sm:$0xff]  }
 0x11b   : > { %1673 = vmatpush1.bf16.msra.mxu0 %v2657_v45  ;;  %1716 = vmatpush1.bf16.msra.mxu1 %v2660_v46  ;;  %v2738_v41 = vld [vmem:[%s3580_s3 + $0x348] ss:$16 sps:$4 sm:$0xff]   ;;  %v2743_v42 = vld [vmem:[%s3580_s3 + $0x12c] ss:$16 sps:$4 sm:$0xff]  }
 0x11c   : > { %1704 = vmatprep.mubr.bf16.mxu0 %v793_v43  ;;  %1747 = vmatprep.mubr.bf16.mxu1 %v795_v44  ;;  %v2746_v43 = vld [vmem:[%s3580_s3 + $0x32c] ss:$16 sps:$4 sm:$0xff]   ;;  %v2741_v44 = vld [vmem:[%s3580_s3 + $0x128] ss:$16 sps:$4 sm:$0xff]  }
 0x11d   : > { %1674 = vmatprep.subr.bf16.mxu0 %v2665_v49  ;;  %1717 = vmatprep.subr.bf16.mxu1 %v2668_v50  ;;  %v2744_v45 = vld [vmem:[%s3580_s3 + $0x328] ss:$16 sps:$4 sm:$0xff]   ;;  %v2749_v46 = vld [vmem:[%s3580_s3 + $0x10c] ss:$16 sps:$4 sm:$0xff]  }
 0x11e   : > { %v2752_v49 = vld [vmem:[%s3580_s3 + $0x30c] ss:$16 sps:$4 sm:$0xff]   ;;  %v2747_v50 = vld [vmem:[%s3580_s3 + $0x108] ss:$16 sps:$4 sm:$0xff]  }
 0x11f   : > { %1675 = vmatpush1.bf16.msra.mxu0 %v2663_v51  ;;  %1718 = vmatpush1.bf16.msra.mxu1 %v2666_v52  ;;  %v2750_v51 = vld [vmem:[%s3580_s3 + $0x308] ss:$16 sps:$4 sm:$0xff]  }
 0x120   : > { %1676 = vmatprep.subr.bf16.mxu0 %v2671_v53  ;;  %1719 = vmatprep.subr.bf16.mxu1 %v2674_v54  ;;  %v2753_v52 = vld [vmem:[%s3582_s5 + $0x78] sm:$0xff]   ;;  %v2755_v54 = vld [vmem:[%s3582_s5 + $0x70] sm:$0xff]  }
 0x121   : > { %v2754_v53 = vld [vmem:[%s3582_s5 + $0x38] sm:$0xff]  }
 0x123   : > { %1677 = vmatpush1.bf16.msra.mxu0 %v2669_v55  ;;  %1720 = vmatpush1.bf16.msra.mxu1 %v2672_v56  ;;  %v2756_v55 = vld [vmem:[%s3582_s5 + $0x30] sm:$0xff]   ;;  %v2757_v56 = vld [vmem:[%s3582_s5 + $0x68] sm:$0xff]  }
 0x124   : > { %1678 = vmatprep.subr.bf16.mxu0 %v2677_v57  ;;  %1721 = vmatprep.subr.bf16.mxu1 %v2680_v58  ;;  %v2758_v57 = vld [vmem:[%s3582_s5 + $0x28] sm:$0xff]   ;;  %v2761_v58 = vld [vmem:[%s3582_s5 + $0x58] sm:$0xff]  }
 0x127   : > { %1679 = vmatpush1.bf16.msra.mxu0 %v2675_v59  ;;  %1722 = vmatpush1.bf16.msra.mxu1 %v2678_v60  ;;  %v2762_v59 = vld [vmem:[%s3582_s5 + $0x18] sm:$0xff]   ;;  %v2763_v60 = vld [vmem:[%s3582_s5 + $0x50] sm:$0xff]  }
 0x128   : > { %1680 = vmatprep.subr.bf16.mxu0 %v2683_v61  ;;  %1723 = vmatprep.subr.bf16.mxu1 %v2686_v62  ;;  %v2769_v61 = vld [vmem:[%s3582_s5 + $0xf8] sm:$0xff]  }
 0x129   : > { %v2770_v62 = vld [vmem:[%s3582_s5 + $0xb8] sm:$0xff]  }
 0x12b   : > { %1681 = vmatpush1.bf16.msra.mxu0 %v2681_v63  ;;  %1724 = vmatpush1.bf16.msra.mxu1 %v2684_v0  ;;  %v2771_v63 = vld [vmem:[%s3582_s5 + $0xf0] sm:$0xff]  }
 0x12c   : > { %1682 = vmatprep.subr.bf16.mxu0 %v2689_v1  ;;  %1725 = vmatprep.subr.bf16.mxu1 %v2692_v2  ;;  %v2764_v0 = vld [vmem:[%s3582_s5 + $0x10] sm:$0xff]   ;;  %v2765_v1 = vld [vmem:[%s3582_s5 + $0x48] sm:$0xff]  }
 0x12d   : > { %v2772_v2 = vld [vmem:[%s3582_s5 + $0xb0] sm:$0xff]  }
 0x12f   : > { %1683 = vmatpush1.bf16.msra.mxu0 %v2687_v3  ;;  %1726 = vmatpush1.bf16.msra.mxu1 %v2690_v4  ;;  %v2773_v3 = vld [vmem:[%s3582_s5 + $0xe8] sm:$0xff]  }
 0x130   : > { %1684 = vmatprep.subr.bf16.mxu0 %v2695_v5  ;;  %1727 = vmatprep.subr.bf16.mxu1 %v2698_v6  ;;  %v2766_v4 = vld [vmem:[%s3582_s5 + $0x8] sm:$0xff]   ;;  %v2767_v5 = vld [vmem:[%s3582_s5 + $0x40] sm:$0xff]  }
 0x131   : > { %v2774_v6 = vld [vmem:[%s3582_s5 + $0xa8] sm:$0xff]  }
 0x133   : > { %1685 = vmatpush1.bf16.msra.mxu0 %v2693_v7  ;;  %1728 = vmatpush1.bf16.msra.mxu1 %v2696_v8  ;;  %v2775_v7 = vld [vmem:[%s3582_s5 + $0xe0] sm:$0xff]  }
 0x134   : > { %1686 = vmatprep.subr.bf16.mxu0 %v2701_v14  ;;  %1729 = vmatprep.subr.bf16.mxu1 %v2704_v15  ;;  %v2768_v8 = vld [vmem:[%s3582_s5] sm:$0xff]   ;;  %v2777_v15 = vld [vmem:[%s3582_s5 + $0xd8] sm:$0xff]  }
 0x135   : > { %v2776_v14 = vld [vmem:[%s3582_s5 + $0xa0] sm:$0xff]  }
 0x137   : > { %1687 = vmatpush1.bf16.msra.mxu0 %v2699_v16  ;;  %1730 = vmatpush1.bf16.msra.mxu1 %v2702_v17  ;;  %v2778_v16 = vld [vmem:[%s3582_s5 + $0x98] sm:$0xff]   ;;  %v2779_v17 = vld [vmem:[%s3582_s5 + $0xd0] sm:$0xff]  }
 0x138   : > { %1688 = vmatprep.subr.bf16.mxu0 %v2707_v18  ;;  %1731 = vmatprep.subr.bf16.mxu1 %v2710_v19  ;;  %v2780_v18 = vld [vmem:[%s3582_s5 + $0x90] sm:$0xff]   ;;  %v2781_v19 = vld [vmem:[%s3582_s5 + $0xc8] sm:$0xff]  }
 0x13b   : > { %1689 = vmatpush2.bf16.msra.mxu0 %v2705_v20  ;;  %1732 = vmatpush2.bf16.msra.mxu1 %v2708_v21  ;;  %v2782_v20 = vld [vmem:[%s3582_s5 + $0x88] sm:$0xff]   ;;  %v2783_v21 = vld [vmem:[%s3582_s5 + $0xc0] sm:$0xff]  }
 0x13c   : > { %1690 = vmatprep.subr.bf16.mxu0 %v2713_v22  ;;  %1733 = vmatprep.subr.bf16.mxu1 %v2716_v23  ;;  %v2784_v22 = vld [vmem:[%s3582_s5 + $0x80] sm:$0xff]  }
 0x13d   : > { %v924_v23 = vld [vmem:[%s3581_s4] sm:$0xf] }
 0x13f   : > { %1691 = vmatpush2.bf16.msra.mxu0 %v2711_v24  ;;  %1734 = vmatpush2.bf16.msra.mxu1 %v2714_v25  ;;  %v933_v24 = vrot.slane %v924_v23, %v364_v10  ;;  %v929_v25 = vrot.slane %v924_v23, %v360_v12 }
 0x140   : > { %1692 = vmatprep.subr.bf16.mxu0 %v2719_v26  ;;  %1735 = vmatprep.subr.bf16.mxu1 %v2722_v27 }
 0x143   : > { %1693 = vmatpush2.bf16.msra.mxu0 %v2717_v28  ;;  %1736 = vmatpush2.bf16.msra.mxu1 %v2720_v29 }
 0x144   : > { %1694 = vmatprep.subr.bf16.mxu0 %v2725_v30  ;;  %1737 = vmatprep.subr.bf16.mxu1 %v2728_v31 }
 0x147   : > { %1695 = vmatpush2.bf16.msra.mxu0 %v2723_v32  ;;  %1738 = vmatpush2.bf16.msra.mxu1 %v2726_v33 }
 0x148   : > { %1696 = vmatprep.subr.bf16.mxu0 %v2731_v34  ;;  %1739 = vmatprep.subr.bf16.mxu1 %v2734_v35 }
 0x14b   : > { %1697 = vmatpush2.bf16.msra.mxu0 %v2729_v36  ;;  %1740 = vmatpush2.bf16.msra.mxu1 %v2732_v37 }
 0x14c   : > { %1698 = vmatprep.subr.bf16.mxu0 %v2737_v38  ;;  %1741 = vmatprep.subr.bf16.mxu1 %v2740_v39 }
 0x14f   : > { %1699 = vmatpush2.bf16.msra.mxu0 %v2735_v40  ;;  %1742 = vmatpush2.bf16.msra.mxu1 %v2738_v41 }
 0x150   : > { %1700 = vmatprep.subr.bf16.mxu0 %v2743_v42  ;;  %1743 = vmatprep.subr.bf16.mxu1 %v2746_v43 }
 0x153   : > { %1701 = vmatpush2.bf16.msra.mxu0 %v2741_v44  ;;  %1744 = vmatpush2.bf16.msra.mxu1 %v2744_v45 }
 0x154   : > { %1702 = vmatprep.subr.bf16.mxu0 %v2749_v46  ;;  %1745 = vmatprep.subr.bf16.mxu1 %v2752_v49  ;;  %v941_v46 = vrot.slane %v924_v23, %v372_v11  ;;  %v937_v49 = vrot.slane %v924_v23, %v368_v13 }
 0x157   : > { %1703 = vmatpush2.bf16.msra.mxu0 %v2747_v50  ;;  %1746 = vmatpush2.bf16.msra.mxu1 %v2750_v51 }
 0x158   : > { %2413 = vmatprep.subr.bf16.mxu0 %v2753_v52  ;;  %2435 = vmatprep.subr.bf16.mxu1 %v2769_v61 }
 0x15a   : > { %1705 = vmatmul.mubr.bf16.vlgmr.msra.gmra.mxu0 %v3272_v47  ;;  %1748 = vmatmul.mubr.bf16.vlgmr.msra.gmra.mxu1 %v3274_v48  ;;  %v2759_v47 = vld [vmem:[%s3582_s5 + $0x60] sm:$0xff]  }
 0x15b   : > { %2414 = vmatpush3.bf16.msra.mxu0 %v2754_v53  ;;  %v2760_v48 = vld [vmem:[%s3582_s5 + $0x20] sm:$0xff]   ;;  %2436 = vmatpush3.bf16.msra.mxu1 %v2770_v62 }
 0x15c   : > { %2415 = vmatprep.subr.bf16.mxu0 %v2755_v54  ;;  %2437 = vmatprep.subr.bf16.mxu1 %v2771_v63 }
 0x15f   : > { %2416 = vmatpush3.bf16.msra.mxu0 %v2756_v55  ;;  %2438 = vmatpush3.bf16.msra.mxu1 %v2772_v2 }
 0x160   : > { %2417 = vmatprep.subr.bf16.mxu0 %v2757_v56  ;;  %2439 = vmatprep.subr.bf16.mxu1 %v2773_v3 }
 0x163   : > { %2418 = vmatpush3.bf16.msra.mxu0 %v2758_v57  ;;  %2440 = vmatpush3.bf16.msra.mxu1 %v2774_v6 }
 0x164   : > { %2419 = vmatprep.subr.bf16.mxu0 %v2759_v47  ;;  %2441 = vmatprep.subr.bf16.mxu1 %v2775_v7  ;;  %v2377_v7 = vld [vmem:[%s3583_s6] ss:$0 sm:$0xff] }
 0x167   : > { %2420 = vmatpush3.bf16.msra.mxu0 %v2760_v48  ;;  %2442 = vmatpush3.bf16.msra.mxu1 %v2776_v14 }
 0x168   : > { %2421 = vmatprep.subr.bf16.mxu0 %v2761_v58  ;;  %2443 = vmatprep.subr.bf16.mxu1 %v2777_v15 }
 0x16b   : > { %2422 = vmatpush3.bf16.msra.mxu0 %v2762_v59  ;;  %2444 = vmatpush3.bf16.msra.mxu1 %v2778_v16 }
 0x16c   : > { %2423 = vmatprep.subr.bf16.mxu0 %v2763_v60  ;;  %2445 = vmatprep.subr.bf16.mxu1 %v2779_v17 }
 0x16f   : > { %2424 = vmatpush3.bf16.msra.mxu0 %v2764_v0  ;;  %2446 = vmatpush3.bf16.msra.mxu1 %v2780_v18 }
 0x170   : > { %2425 = vmatprep.subr.bf16.mxu0 %v2765_v1  ;;  %2447 = vmatprep.subr.bf16.mxu1 %v2781_v19 }
 0x173   : > { %2426 = vmatpush3.bf16.msra.mxu0 %v2766_v4  ;;  %2448 = vmatpush3.bf16.msra.mxu1 %v2782_v20 }
 0x174   : > { %2427 = vmatprep.subr.bf16.mxu0 %v2767_v5  ;;  %2449 = vmatprep.subr.bf16.mxu1 %v2783_v21 }
 0x177   : > { %2428 = vmatpush3.bf16.msra.mxu0 %v2768_v8  ;;  %2450 = vmatpush3.bf16.msra.mxu1 %v2784_v22 }
 0x1da   : > { %v1620_v26 = vpop.f32.mrf.mxu0  ;;  %v1663_v27 = vpop.f32.mrf.mxu1 }
 0x1db   : > { %v1621_v31 = vadd.f32 %v1620_v26, %v929_v25 }
 0x1dc   : > { %v1622_v28 = vpop.f32.mrf.mxu0  ;;  %v1665_v29 = vpop.f32.mrf.mxu1 }
 0x1dd   : > { %v1623_v30 = vadd.f32 %v1622_v28, %v933_v24  ;;  %v1664_v39 = vadd.f32 %v1663_v27, %v1621_v31 }
 0x1de   : > { %v1624_v32 = vpop.f32.mrf.mxu0  ;;  %v1667_v33 = vpop.f32.mrf.mxu1 }
 0x1df   : > { %v1625_v34 = vadd.f32 %v1624_v32, %v929_v25  ;;  %v1666_v36 = vadd.f32 %v1665_v29, %v1623_v30  ;;  %v1758_v12 = vmax.f32 %v1664_v39, 0.0 }
 0x1e0   : > { %v1626_v35 = vpop.f32.mrf.mxu0  ;;  %v1669_v40 = vpop.f32.mrf.mxu1 }
 0x1e1   : > { %v1668_v37 = vadd.f32 %v1667_v33, %v1625_v34  ;;  %v1627_v38 = vadd.f32 %v1626_v35, %v933_v24  ;;  %v1759_v42 = vmax.f32 %v1666_v36, 0.0 }
 0x1e3   : > { %v1670_v41 = vadd.f32 %v1669_v40, %v1627_v38  ;;  %v1762_v10 = vmax.f32 %v1668_v37, 0.0 }
 0x1e5   : > { %v1763_v43 = vmax.f32 %v1670_v41, 0.0  ;;  %v1766_v45 = vpack.c.bf16 %v1762_v10, %v1758_v12 }
 0x1e7   : > { %v1767_v44 = vpack.c.bf16 %v1763_v43, %v1759_v42 }
 0x1e9   : > { %2065 = vmatprep.mubr.bf16.mxu0 %v1767_v44 }
 0x1ea   : > { %2066 = vmatmul.mubr.bf16.vlgmr.msra.gmra.mxu0 %v1766_v45 }
 0x21a   : > { %v1706_v50 = vpop.f32.mrf.mxu0  ;;  %v1749_v51 = vpop.f32.mrf.mxu1 }
 0x21b   : > { %v1707_v55 = vadd.f32 %v1706_v50, %v937_v49 }
 0x21c   : > { %v1708_v52 = vpop.f32.mrf.mxu0  ;;  %v1751_v53 = vpop.f32.mrf.mxu1 }
 0x21d   : > { %v1709_v54 = vadd.f32 %v1708_v52, %v941_v46  ;;  %v1750_v61 = vadd.f32 %v1749_v51, %v1707_v55 }
 0x21e   : > { %v1710_v56 = vpop.f32.mrf.mxu0  ;;  %v1753_v57 = vpop.f32.mrf.mxu1 }
 0x21f   : > { %v1711_v47 = vadd.f32 %v1710_v56, %v937_v49  ;;  %v1752_v58 = vadd.f32 %v1751_v53, %v1709_v54  ;;  %v1760_v13 = vmax.f32 %v1750_v61, 0.0 }
 0x220   : > { %v1712_v48 = vpop.f32.mrf.mxu0  ;;  %v1755_v62 = vpop.f32.mrf.mxu1 }
 0x221   : > { %v1754_v59 = vadd.f32 %v1753_v57, %v1711_v47  ;;  %v1713_v60 = vadd.f32 %v1712_v48, %v941_v46  ;;  %v1761_v0 = vmax.f32 %v1752_v58, 0.0 }
 0x223   : > { %v1756_v63 = vadd.f32 %v1755_v62, %v1713_v60  ;;  %v1764_v11 = vmax.f32 %v1754_v59, 0.0 }
 0x225   : > { %v1765_v9 = vmax.f32 %v1756_v63, 0.0  ;;  %v1768_v2 = vpack.c.bf16 %v1764_v11, %v1760_v13 }
 0x227   : > { %v1769_v1 = vpack.c.bf16 %v1765_v9, %v1761_v0 }
 0x229   : > { %2106 = vmatprep.mubr.bf16.mxu1 %v1769_v1 }
 0x22a   : > { %2107 = vmatmul.mubr.bf16.vlgmr.msra.gmra.mxu1 %v1768_v2 }
 0x2aa   : > { %v2429_v3 = vpop.f32.mrf.mxu0 }
 0x2ac   : > { %v2430_v4 = vpop.f32.mrf.mxu0 }
 0x2ad   : > { %v2431_v6 = vadd.f32 %v2430_v4, %v2429_v3 }
 0x2ae   : > { %v2432_v5 = vpop.f32.mrf.mxu0 }
 0x2af   : > { %v2068_v16 = vadd.f32 %v2431_v6, %v2377_v7 }
 0x2b0   : > { %v2433_v8 = vpop.f32.mrf.mxu0 }
 0x2b1   : > { %v2434_v17 = vadd.f32 %v2433_v8, %v2432_v5 }
 0x2b3   : > { %v2071_v22 = vadd.f32 %v2434_v17, %v2377_v7 }
 0x2ea   : > { %v2451_v14 = vpop.f32.mrf.mxu1 }
 0x2ec   : > { %v2452_v15 = vpop.f32.mrf.mxu1 }
 0x2ed   : > { %v2453_v18 = vadd.f32 %v2452_v15, %v2451_v14 }
 0x2ee   : > { %v2454_v19 = vpop.f32.mrf.mxu1 }
 0x2ef   : > { %v2109_v20 = vadd.f32 %v2453_v18, %v2068_v16 }
 0x2f0   : > { %v2455_v21 = vpop.f32.mrf.mxu1 }
 0x2f1   : > { %2785 = vtanh.f32 %v2109_v20  ;;  %v2456_v23 = vadd.f32 %v2455_v21, %v2454_v19 }
 0x2f3   : > { %v2112_v24 = vadd.f32 %v2456_v23, %v2071_v22 }
 0x2f5   : > { %2787 = vtanh.f32 %v2112_v24 }
 0x2fe   : > { %v2786_v25 = vpop.eup %2785 }
 0x2ff   : > { %2117 = vst [vmem:[%s283_s27] sm:$0xff] %v2786_v25 }
 0x302   : > { %v2788_v26 = vpop.eup %2787 }
 0x303   : > { %2118 = vst [vmem:[%s283_s27 + $0x8] sm:$0xff] %v2788_v26 }
 0x304 PF: > { %s17_s24 = sadd.s32 1, %s2795_s24  }
 0x305   : > { %p14_p4 = scmp.ge.s32.totalorder %s17_s24, 6  }
 0x307   :  { %16 = sbr.rel (!%p14_p4) target bundleno = 1 (0x1), region = 78 }

</bundles_post_ra>
